<compile_context>
chip_gen: v6e
topology: v6e:2x2x1
jax: 0.10.0
libtpu: 0.0.40
codegen_flags: <defaults>
</compile_context>

<pallas_src>
import jax
import jax.numpy as jnp
from jax.experimental import pallas as pl
from jax.experimental.pallas import tpu as pltpu


def _round_up(x, m):
    return ((x + m - 1) // m) * m


def mlp_regression_kernel(z_ref,
                          w1_ref, b1_ref,
                          w2_ref, b2_ref,
                          w3_ref, b3_ref,
                          w4_ref, b4_ref,
                          out_ref):
    def layer(x, w_ref, b_ref, relu):
        # MXU operands in the weight dtype (bf16 by default, f32 optional);
        # accumulate in f32; bias add / ReLU / clip kept in f32.
        y = jnp.dot(x.astype(w_ref.dtype), w_ref[...],
                    preferred_element_type=jnp.float32)
        y = y + b_ref[...].astype(jnp.float32)
        return jnp.maximum(y, 0.0) if relu else y

    h = layer(z_ref[...], w1_ref, b1_ref, relu=True)   # fc1 + folded bn1 + relu
    h = layer(h, w2_ref, b2_ref, relu=True)            # fc2 + folded bn2 + relu
    h = layer(h, w3_ref, b3_ref, relu=True)            # fc3 + relu
    y = layer(h, w4_ref, b4_ref, relu=False)           # fc4
    out_ref[...] = jnp.clip(y, 0.0, 1.0).astype(out_ref.dtype)  # Hardtanh(0,1)


def mlp_regression_forward(z, params, *, tile_m=4096, use_bf16=True,
                           pad_out_lanes=False, out_dtype=None,
                           vmem_limit_bytes=None):
    """z: (B, dim_z) f32; params: folded (w1,b1,w2,b2,w3,b3,w4,b4)."""
    w1, b1, w2, b2, w3, b3, w4, b4 = params
    B, dim_z = z.shape
    hidden = w1.shape[1]
    out_dim = w4.shape[1]

    # --- output width: unpadded by default (min HBM writeback); optional
    #     lane-dense 128-col variant for benchmarking the vst effect ---------
    if pad_out_lanes:
        n_out = _round_up(out_dim, 128)
        if n_out != out_dim:
            w4 = jnp.zeros((w4.shape[0], n_out), w4.dtype).at[:, :out_dim].set(w4)
            b4 = jnp.zeros((1, n_out), b4.dtype).at[:, :out_dim].set(b4)
    else:
        n_out = out_dim

    # --- dtypes: bf16 MXU operands + bf16 writeback by default --------------
    compute_dtype = jnp.bfloat16 if use_bf16 else z.dtype
    if out_dtype is None:
        out_dtype = compute_dtype
    zc = z.astype(compute_dtype)
    w1, w2, w3, w4 = (w.astype(compute_dtype) for w in (w1, w2, w3, w4))
    # biases stay f32: elementwise math kept in f32 (v5e VPU has no bf16).

    # --- batch tile: multiple of 8 sublanes, large by default, but capped at
    #     ~ceil(B/2) so large batches always give >=2 grid steps (v7x 2 TCs) --
    half = _round_up(pl.cdiv(B, 2), 8)
    tm = max(8, min(_round_up(tile_m, 8), half))
    grid = (pl.cdiv(B, tm),)           # ragged last tile handled by Pallas

    # --- explicit scoped-VMEM limit (v5e default is only 16 MiB) ------------
    if vmem_limit_bytes is None:
        in_b = jnp.dtype(compute_dtype).itemsize
        out_b = jnp.dtype(out_dtype).itemsize
        est = 2 * tm * dim_z * in_b                    # z tile, double-buffered
        est += 2 * tm * n_out * out_b                  # out tile, double-buffered
        est += 3 * tm * hidden * 4                     # live f32 intermediates
        est += 2 * sum(int(a.size) * jnp.dtype(a.dtype).itemsize
                       for a in (w1, b1, w2, b2, w3, b3, w4, b4))
        vmem_limit_bytes = int(min(64 * 1024 * 1024,
                                   max(32 * 1024 * 1024, 2 * est)))

    # Constant index_map => weights/biases DMA'd once and stay resident.
    resident = lambda a: pl.BlockSpec(a.shape, lambda i: (0, 0))

    out = pl.pallas_call(
        mlp_regression_kernel,
        out_shape=jax.ShapeDtypeStruct((B, n_out), out_dtype),
        grid=grid,
        in_specs=[pl.BlockSpec((tm, dim_z), lambda i: (i, 0)),
                  resident(w1), resident(b1),
                  resident(w2), resident(b2),
                  resident(w3), resident(b3),
                  resident(w4), resident(b4)],
        out_specs=pl.BlockSpec((tm, n_out), lambda i: (i, 0)),
        compiler_params=pltpu.CompilerParams(
            dimension_semantics=("parallel",),
            vmem_limit_bytes=vmem_limit_bytes),
    )(zc, w1, b1, w2, b2, w3, b3, w4, b4)

    return out if n_out == out_dim else out[:, :out_dim]


def init_params(key, dim_z, hidden, out_dim):
    """PyTorch-default-like init (Linear: U(+-1/sqrt(fan_in)); BN1d: gamma=1,
    beta=0, running_mean=0, running_var=1, eps=1e-5) with inference-mode BN
    folded into fc1/fc2 on the host."""
    def linear(k, fan_in, fan_out):
        kw, kb = jax.random.split(k)
        bound = 1.0 / jnp.sqrt(fan_in)
        w = jax.random.uniform(kw, (fan_in, fan_out), jnp.float32, -bound, bound)
        b = jax.random.uniform(kb, (1, fan_out), jnp.float32, -bound, bound)
        return w, b

    k1, k2, k3, k4 = jax.random.split(key, 4)
    w1, b1 = linear(k1, dim_z, hidden)
    w2, b2 = linear(k2, hidden, hidden)
    w3, b3 = linear(k3, hidden, hidden)
    w4, b4 = linear(k4, hidden, out_dim)

    eps = 1e-5
    gamma = jnp.ones((1, hidden), jnp.float32)
    beta = jnp.zeros((1, hidden), jnp.float32)
    running_mean = jnp.zeros((1, hidden), jnp.float32)
    running_var = jnp.ones((1, hidden), jnp.float32)
    scale = gamma / jnp.sqrt(running_var + eps)   # inference-mode BN scale
    shift = beta - running_mean * scale           # inference-mode BN shift

    # Fold BN affine into the preceding Linear: y*s + t == x @ (w*s) + (b*s + t)
    w1f, b1f = w1 * scale, b1 * scale + shift
    w2f, b2f = w2 * scale, b2 * scale + shift
    return (w1f, b1f, w2f, b2f, w3, b3, w4, b4)


def reference_forward(z, params, compute_dtype=jnp.float32):
    """Pure-JAX reference; compute_dtype mirrors the kernel's MXU-operand cast."""
    w1, b1, w2, b2, w3, b3, w4, b4 = params

    def lin(x, w, b):
        return jnp.dot(x.astype(compute_dtype), w.astype(compute_dtype),
                       preferred_element_type=jnp.float32) + b

    h = jnp.maximum(lin(z, w1, b1), 0.0)
    h = jnp.maximum(lin(h, w2, b2), 0.0)
    h = jnp.maximum(lin(h, w3, b3), 0.0)
    return jnp.clip(lin(h, w4, b4), 0.0, 1.0)


if __name__ == "__main__":
    # architecture '3l32', dim_z=32, learnable_preset_size=24, batch=8
    B, DIM_Z, HIDDEN, OUT = 8, 32, 32, 24

    key = jax.random.PRNGKey(0)
    k_params, k_z, k_z2 = jax.random.split(key, 3)
    params = init_params(k_params, DIM_Z, HIDDEN, OUT)
    z_K = jax.random.normal(k_z, (B, DIM_Z), jnp.float32)

    ref_f32 = reference_forward(z_K, params)
    ref_bf16 = reference_forward(z_K, params, compute_dtype=jnp.bfloat16)

    # Default path: bf16 MXU operands, bf16 unpadded output.
    out = jax.block_until_ready(mlp_regression_forward(z_K, params))
    assert out.shape == (B, OUT)
    assert out.dtype == jnp.bfloat16
    out_f = out.astype(jnp.float32)
    assert jnp.allclose(out_f, ref_bf16, atol=1e-2, rtol=1e-2)   # vs bf16 ref
    assert jnp.allclose(out_f, ref_f32, atol=3e-2, rtol=3e-2)    # vs f32 ref

    # Full-precision path: tight tolerance.
    out_f32 = jax.block_until_ready(
        mlp_regression_forward(z_K, params, use_bf16=False))
    assert out_f32.dtype == jnp.float32
    assert jnp.allclose(out_f32, ref_f32, atol=1e-5, rtol=1e-5)

    # Multi-tile path with a ragged last tile (grid=3, last tile 4/8 rows valid).
    B2 = 20
    z2 = jax.random.normal(k_z2, (B2, DIM_Z), jnp.float32)
    out2 = jax.block_until_ready(
        mlp_regression_forward(z2, params, tile_m=8, use_bf16=False))
    assert out2.shape == (B2, OUT)
    assert jnp.allclose(out2, reference_forward(z2, params), atol=1e-5, rtol=1e-5)

    # Lane-padded-output variant (kept for vst-vs-writeback benchmarking).
    out3 = jax.block_until_ready(
        mlp_regression_forward(z_K, params, use_bf16=False, pad_out_lanes=True))
    assert out3.shape == (B, OUT)
    assert jnp.allclose(out3, ref_f32, atol=1e-5, rtol=1e-5)

    print("KERNEL_OK")
</pallas_src>

<mosaic_0001>
module attributes {stable_mosaic.version = 11 : i64} {
  func.func @mlp_regression_kernel(%arg0: i32, %arg1: memref<8x32xbf16, #tpu.memory_space<vmem>>, %arg2: memref<32x32xbf16, #tpu.memory_space<vmem>>, %arg3: memref<1x32xf32, #tpu.memory_space<vmem>>, %arg4: memref<32x32xbf16, #tpu.memory_space<vmem>>, %arg5: memref<1x32xf32, #tpu.memory_space<vmem>>, %arg6: memref<32x32xbf16, #tpu.memory_space<vmem>>, %arg7: memref<1x32xf32, #tpu.memory_space<vmem>>, %arg8: memref<32x24xbf16, #tpu.memory_space<vmem>>, %arg9: memref<1x24xf32, #tpu.memory_space<vmem>>, %arg10: memref<8x24xbf16, #tpu.memory_space<vmem>>) attributes {dimension_semantics = [#tpu.dimension_semantics<parallel>], iteration_bounds = array<i64: 1>, scalar_prefetch = 0 : i64, scratch_operands = 0 : i64, tpu.core_type = #tpu.core_type<tc>, window_params = [{transform_indices = @transform_0, window_bounds = array<i64: 8, 32>}, {pipeline_mode = #tpu.pipeline_mode<synchronous>, transform_indices = @transform_1, window_bounds = array<i64: 32, 32>}, {pipeline_mode = #tpu.pipeline_mode<synchronous>, transform_indices = @transform_2, window_bounds = array<i64: 1, 32>}, {pipeline_mode = #tpu.pipeline_mode<synchronous>, transform_indices = @transform_3, window_bounds = array<i64: 32, 32>}, {pipeline_mode = #tpu.pipeline_mode<synchronous>, transform_indices = @transform_4, window_bounds = array<i64: 1, 32>}, {pipeline_mode = #tpu.pipeline_mode<synchronous>, transform_indices = @transform_5, window_bounds = array<i64: 32, 32>}, {pipeline_mode = #tpu.pipeline_mode<synchronous>, transform_indices = @transform_6, window_bounds = array<i64: 1, 32>}, {pipeline_mode = #tpu.pipeline_mode<synchronous>, transform_indices = @transform_7, window_bounds = array<i64: 32, 24>}, {pipeline_mode = #tpu.pipeline_mode<synchronous>, transform_indices = @transform_8, window_bounds = array<i64: 1, 24>}, {transform_indices = @transform_9, window_bounds = array<i64: 8, 24>}]} {
    %c0 = arith.constant 0 : index
    %c0_0 = arith.constant 0 : index
    %0 = vector.load %arg1[%c0, %c0_0] : memref<8x32xbf16, #tpu.memory_space<vmem>>, vector<8x32xbf16>
    %c0_1 = arith.constant 0 : index
    %c0_2 = arith.constant 0 : index
    %1 = vector.load %arg2[%c0_1, %c0_2] : memref<32x32xbf16, #tpu.memory_space<vmem>>, vector<32x32xbf16>
    %cst = arith.constant dense<0.000000e+00> : vector<8x32xf32>
    %2 = tpu.matmul %0, %1, %cst {dimension_numbers = #tpu.dot_dimension_numbers<[1], [0], [0], [1], [0, 0, 1, 1], [], []>} : vector<8x32xbf16>, vector<32x32xbf16>, vector<8x32xf32> -> vector<8x32xf32>
    %c0_3 = arith.constant 0 : index
    %c0_4 = arith.constant 0 : index
    %3 = vector.load %arg3[%c0_3, %c0_4] : memref<1x32xf32, #tpu.memory_space<vmem>>, vector<1x32xf32>
    %4 = vector.broadcast %3 : vector<1x32xf32> to vector<8x32xf32>
    %5 = arith.addf %2, %4 : vector<8x32xf32>
    %cst_5 = arith.constant 0.000000e+00 : f32
    %6 = vector.broadcast %cst_5 : f32 to vector<8x32xf32>
    %7 = arith.maximumf %5, %6 : vector<8x32xf32>
    %8 = arith.truncf %7 : vector<8x32xf32> to vector<8x32xbf16>
    %c0_6 = arith.constant 0 : index
    %c0_7 = arith.constant 0 : index
    %9 = vector.load %arg4[%c0_6, %c0_7] : memref<32x32xbf16, #tpu.memory_space<vmem>>, vector<32x32xbf16>
    %cst_8 = arith.constant dense<0.000000e+00> : vector<8x32xf32>
    %10 = tpu.matmul %8, %9, %cst_8 {dimension_numbers = #tpu.dot_dimension_numbers<[1], [0], [0], [1], [0, 0, 1, 1], [], []>} : vector<8x32xbf16>, vector<32x32xbf16>, vector<8x32xf32> -> vector<8x32xf32>
    %c0_9 = arith.constant 0 : index
    %c0_10 = arith.constant 0 : index
    %11 = vector.load %arg5[%c0_9, %c0_10] : memref<1x32xf32, #tpu.memory_space<vmem>>, vector<1x32xf32>
    %12 = vector.broadcast %11 : vector<1x32xf32> to vector<8x32xf32>
    %13 = arith.addf %10, %12 : vector<8x32xf32>
    %cst_11 = arith.constant 0.000000e+00 : f32
    %14 = vector.broadcast %cst_11 : f32 to vector<8x32xf32>
    %15 = arith.maximumf %13, %14 : vector<8x32xf32>
    %16 = arith.truncf %15 : vector<8x32xf32> to vector<8x32xbf16>
    %c0_12 = arith.constant 0 : index
    %c0_13 = arith.constant 0 : index
    %17 = vector.load %arg6[%c0_12, %c0_13] : memref<32x32xbf16, #tpu.memory_space<vmem>>, vector<32x32xbf16>
    %cst_14 = arith.constant dense<0.000000e+00> : vector<8x32xf32>
    %18 = tpu.matmul %16, %17, %cst_14 {dimension_numbers = #tpu.dot_dimension_numbers<[1], [0], [0], [1], [0, 0, 1, 1], [], []>} : vector<8x32xbf16>, vector<32x32xbf16>, vector<8x32xf32> -> vector<8x32xf32>
    %c0_15 = arith.constant 0 : index
    %c0_16 = arith.constant 0 : index
    %19 = vector.load %arg7[%c0_15, %c0_16] : memref<1x32xf32, #tpu.memory_space<vmem>>, vector<1x32xf32>
    %20 = vector.broadcast %19 : vector<1x32xf32> to vector<8x32xf32>
    %21 = arith.addf %18, %20 : vector<8x32xf32>
    %cst_17 = arith.constant 0.000000e+00 : f32
    %22 = vector.broadcast %cst_17 : f32 to vector<8x32xf32>
    %23 = arith.maximumf %21, %22 : vector<8x32xf32>
    %24 = arith.truncf %23 : vector<8x32xf32> to vector<8x32xbf16>
    %c0_18 = arith.constant 0 : index
    %c0_19 = arith.constant 0 : index
    %25 = vector.load %arg8[%c0_18, %c0_19] : memref<32x24xbf16, #tpu.memory_space<vmem>>, vector<32x24xbf16>
    %cst_20 = arith.constant dense<0.000000e+00> : vector<8x24xf32>
    %26 = tpu.matmul %24, %25, %cst_20 {dimension_numbers = #tpu.dot_dimension_numbers<[1], [0], [0], [1], [0, 0, 1, 1], [], []>} : vector<8x32xbf16>, vector<32x24xbf16>, vector<8x24xf32> -> vector<8x24xf32>
    %c0_21 = arith.constant 0 : index
    %c0_22 = arith.constant 0 : index
    %27 = vector.load %arg9[%c0_21, %c0_22] : memref<1x24xf32, #tpu.memory_space<vmem>>, vector<1x24xf32>
    %28 = vector.broadcast %27 : vector<1x24xf32> to vector<8x24xf32>
    %29 = arith.addf %26, %28 : vector<8x24xf32>
    %cst_23 = arith.constant 0.000000e+00 : f32
    %cst_24 = arith.constant 1.000000e+00 : f32
    %30 = vector.broadcast %cst_23 : f32 to vector<8x24xf32>
    %31 = arith.maximumf %30, %29 : vector<8x24xf32>
    %32 = vector.broadcast %cst_24 : f32 to vector<8x24xf32>
    %33 = arith.minimumf %32, %31 : vector<8x24xf32>
    %34 = arith.truncf %33 : vector<8x24xf32> to vector<8x24xbf16>
    %c0_25 = arith.constant 0 : index
    %c0_26 = arith.constant 0 : index
    %35 = vector.load %arg10[%c0_25, %c0_26] : memref<8x24xbf16, #tpu.memory_space<vmem>>, vector<8x24xbf16>
    tpu.vector_store %arg10[%c0_25, %c0_26], %34 {strides = array<i32>} : memref<8x24xbf16, #tpu.memory_space<vmem>>, vector<8x24xbf16>,
    return
  }
  func.func @transform_0(%arg0: i32) -> (i32, i32) {
    %c0_i32 = arith.constant 0 : i32
    %c0_i32_0 = arith.constant 0 : i32
    return %arg0, %c0_i32 : i32, i32
  }
  func.func @transform_1(%arg0: i32) -> (i32, i32) {
    %c0_i32 = arith.constant 0 : i32
    %c0_i32_0 = arith.constant 0 : i32
    %c0_i32_1 = arith.constant 0 : i32
    return %c0_i32, %c0_i32_0 : i32, i32
  }
  func.func @transform_2(%arg0: i32) -> (i32, i32) {
    %c0_i32 = arith.constant 0 : i32
    %c0_i32_0 = arith.constant 0 : i32
    %c0_i32_1 = arith.constant 0 : i32
    return %c0_i32, %c0_i32_0 : i32, i32
  }
  func.func @transform_3(%arg0: i32) -> (i32, i32) {
    %c0_i32 = arith.constant 0 : i32
    %c0_i32_0 = arith.constant 0 : i32
    %c0_i32_1 = arith.constant 0 : i32
    return %c0_i32, %c0_i32_0 : i32, i32
  }
  func.func @transform_4(%arg0: i32) -> (i32, i32) {
    %c0_i32 = arith.constant 0 : i32
    %c0_i32_0 = arith.constant 0 : i32
    %c0_i32_1 = arith.constant 0 : i32
    return %c0_i32, %c0_i32_0 : i32, i32
  }
  func.func @transform_5(%arg0: i32) -> (i32, i32) {
    %c0_i32 = arith.constant 0 : i32
    %c0_i32_0 = arith.constant 0 : i32
    %c0_i32_1 = arith.constant 0 : i32
    return %c0_i32, %c0_i32_0 : i32, i32
  }
  func.func @transform_6(%arg0: i32) -> (i32, i32) {
    %c0_i32 = arith.constant 0 : i32
    %c0_i32_0 = arith.constant 0 : i32
    %c0_i32_1 = arith.constant 0 : i32
    return %c0_i32, %c0_i32_0 : i32, i32
  }
  func.func @transform_7(%arg0: i32) -> (i32, i32) {
    %c0_i32 = arith.constant 0 : i32
    %c0_i32_0 = arith.constant 0 : i32
    %c0_i32_1 = arith.constant 0 : i32
    return %c0_i32, %c0_i32_0 : i32, i32
  }
  func.func @transform_8(%arg0: i32) -> (i32, i32) {
    %c0_i32 = arith.constant 0 : i32
    %c0_i32_0 = arith.constant 0 : i32
    %c0_i32_1 = arith.constant 0 : i32
    return %c0_i32, %c0_i32_0 : i32, i32
  }
  func.func @transform_9(%arg0: i32) -> (i32, i32) {
    %c0_i32 = arith.constant 0 : i32
    %c0_i32_0 = arith.constant 0 : i32
    return %arg0, %c0_i32 : i32, i32
  }
}

</mosaic_0001>

<bundles_post_ra>
// kernel: tpu_custom_call.1
= control target key start
LH: loop header
LB: loop body
LE: loop exit
PB: predicated region body
PF: predicated region fallthrough
CT: control target
= control target key end

     0   :  { %14 = vsyncpa [#allocation3], 0  ;;  %s598_s0 = inlined_call_operand.hbm [shape: bf16[8,32], index: 0, kind: input, shape index: {}]   ;;  %s599_s1 = inlined_call_operand.vmem [shape: bf16[32,32], index: 1, kind: input, shape index: {}]   ;;  %s600_s2 = inlined_call_operand.vmem [shape: f32[1,32], index: 2, kind: input, shape index: {}]   ;;  %s601_s3 = inlined_call_operand.vmem [shape: bf16[32,32], index: 3, kind: input, shape index: {}]   ;;  %s602_s4 = inlined_call_operand.vmem [shape: f32[1,32], index: 4, kind: input, shape index: {}]   ;;  %s603_s5 = inlined_call_operand.hbm [shape: bf16[32,32], index: 5, kind: input, shape index: {}]   ;;  %s604_s6 = inlined_call_operand.vmem [shape: f32[1,32], index: 6, kind: input, shape index: {}]   ;;  %s605_s7 = inlined_call_operand.vmem [shape: bf16[32,24], index: 7, kind: input, shape index: {}]   ;;  %s606_s8 = inlined_call_operand.vmem [shape: f32[1,24], index: 8, kind: input, shape index: {}]   ;;  %s607_s9 = inlined_call_operand.hbm [shape: bf16[8,24], index: 9, kind: output, shape index: {}]  }
   0x1   :  { %15 = vsyncpa [#allocation6], 0 }
   0x2   :  { %16 = vsyncpa [#allocation4], 0  ;;  %s494_s30 = smov [#allocation2]   ;;  %s495_s11 = smov [#allocation5]  }
   0x3   :  { %s23_s10 = sshll.u32 %s494_s30, 4  ;;  %s40_s12 = sshll.u32 %s495_s11, 4  ;;  %s24_s10 = int_to_ptr.vmem [resolvable:$true] %s23_s10  ;;  %s41_s12 = int_to_ptr.vmem [resolvable:$true] %s40_s12 }
   0x4   :  { %s436_s13 = scalar_lea.vmem %s24_s10, 64  ;;  %p441_p1 = scmp.lt.s32.totalorder %s24_s10, %s24_s10 }
   0x5   :  { %p437_p0 = scmp.ne.s32.totalorder %s24_s10, %s436_s13  ;;  %p442_p2 = scmp.lt.s32.totalorder %s436_s13, %s436_s13 }
   0x7   :  { %p443_p3 = por %p442_p2, %p441_p1 }
   0x9   :  { %p444_p4 = pnand %p443_p3, %p437_p0 }
   0xb   :  { %447 = shalt.err (!%p444_p4)
}
   0xc   :  { %26 = dma.hbm_to_vmem [thread:$0]  %s598_s0, 64, %s24_s10, [#allocation3]  }
   0xd   :  { %s456_s16 = scalar_lea.vmem %s41_s12, 256  ;;  %p461_p6 = scmp.lt.s32.totalorder %s41_s12, %s41_s12 }
   0xe   :  { %p457_p5 = scmp.ne.s32.totalorder %s41_s12, %s456_s16  ;;  %p462_p7 = scmp.lt.s32.totalorder %s456_s16, %s456_s16 }
  0x10   :  { %p463_p8 = por %p462_p7, %p461_p6 }
  0x12   :  { %p464_p9 = pnand %p463_p8, %p457_p5 }
  0x14   :  { %467 = shalt.err (!%p464_p9)
}
  0x15   :  { %s496_s17 = smov 64   ;;  %s497_s18 = smov 4  }
  0x16   :  { %46 = dma.hbm_to_vmem [thread:$0]  %s603_s5, 256, %s41_s12, [#allocation6], %s496_s17, %s496_s17, %s497_s18  }
  0x17   :  { %488 = dma.done.wait [#allocation3], 64  }
  0x18   :  { %489 = vsyncadd [#allocation3], 4294967232 }
  0x19   :  { %490 = dma.done.wait [#allocation6], 256  }
  0x1a   :  { %491 = vsyncadd [#allocation6], 4294967040  ;;  %v498_v0 = vmov 0.0   ;;  %vm499_vm0 = vmmov 0   ;;  %v420_v1 = vld [vmem:[%s599_s1 + $0x8] sm:$0xff]   ;;  %v421_v2 = vld [vmem:[%s599_s1] sm:$0xff]  }
  0x1b   :  { %381 = vmatprep.subr.bf16.mxu0 %v498_v0  ;;  %385 = vmatprep.mubr.msk.bf16.mxu0 %vm499_vm0, %v498_v0  ;;  %vm84_vm1 = vcmask 261120   ;;  %v60_v3 = vld [vmem:[#allocation2] sm:$0xf]  ;;  %v422_v4 = vld [vmem:[%s601_s3 + $0x8] sm:$0xff]   ;;  %vm335_vm2 = vcmask 191488  }
  0x1c   :  { %389 = vmatprep.subr.bf16.mxu1 %v498_v0  ;;  %393 = vmatprep.mubr.msk.bf16.mxu1 %vm499_vm0, %v498_v0  ;;  %v423_v5 = vld [vmem:[%s601_s3] sm:$0xff]   ;;  %v424_v6 = vld [vmem:[#allocation5 + $0x8] sm:$0xff]  }
  0x1d   :  { %382 = vmatpush3.bf16.msra.mxu0 %v420_v1  ;;  %390 = vmatpush3.bf16.msra.mxu1 %v422_v4  ;;  %v353_v7 = vld [vmem:[%s600_s2] ss:$0 sm:$0xff]  ;;  %v425_v15 = vld [vmem:[#allocation5] sm:$0xff]  }
  0x1e   :  { %383 = vmatprep.subr.bf16.mxu0 %v498_v0  ;;  %391 = vmatprep.subr.bf16.mxu1 %v498_v0  ;;  %v426_v16 = vld [vmem:[%s605_s7 + $0x8] sm:$0xff]   ;;  %v357_v17 = vld [vmem:[%s602_s4] ss:$0 sm:$0xff] }
  0x1f   :  { %v427_v25 = vld [vmem:[%s605_s7] sm:$0xff]   ;;  %s500_s7 = smov [#allocation7]  }
  0x20   :  { %v361_v26 = vld [vmem:[%s604_s6] ss:$0 sm:$0xff]  ;;  %s343_s6 = sshll.u32 %s500_s7, 4  ;;  %s344_s6 = int_to_ptr.vmem [resolvable:$true] %s343_s6 }
  0x21   :  { %384 = vmatpush3.bf16.msra.mxu0 %v421_v2  ;;  %392 = vmatpush3.bf16.msra.mxu1 %v423_v5  ;;  %v365_v34 = vld [vmem:[%s606_s8] ss:$0 sm:$0xff]  ;;  %s468_s14 = scalar_lea.vmem %s344_s6, 64  ;;  %p473_p11 = scmp.lt.s32.totalorder %s344_s6, %s344_s6 }
  0x22   :  { %397 = vmatprep.subr.bf16.mxu0 %v498_v0  ;;  %405 = vmatprep.subr.bf16.mxu1 %v498_v0  ;;  %p469_p10 = scmp.ne.s32.totalorder %s344_s6, %s468_s14  ;;  %p474_p12 = scmp.lt.s32.totalorder %s468_s14, %s468_s14 }
  0x24   :  { %386 = vmatmul.mubr.msk.bf16.vlgmr.msra.gmra.mxu0 %vm84_vm1, %v60_v3  ;;  %p475_p13 = por %p474_p12, %p473_p11 }
  0x25   :  { %401 = vmatprep.mubr.msk.bf16.mxu0 %vm499_vm0, %v498_v0  ;;  %398 = vmatpush3.bf16.msra.mxu0 %v424_v6 }
  0x26   :  { %399 = vmatprep.subr.bf16.mxu0 %v498_v0  ;;  %p476_p0 = pnand %p475_p13, %p469_p10 }
  0x29   :  { %400 = vmatpush3.bf16.msra.mxu0 %v425_v15 }
  0xe4   :  { %v122_v8 = vpop.f32.mrf.mxu0 }
  0xe5   :  { %v123_v9 = vadd.f32 %v353_v7, %v122_v8 }
  0xe6   :  { %v387_v10 = vpop.f32.mrf.mxu0 }
  0xe7   :  { %v128_v11 = vmax.f32 %v123_v9, 0.0 }
  0xe8   :  { %v125_v12 = vpop.f32.mrf.mxu0 }
  0xe9   :  { %v129_v13 = vpack.c.bf16 %v128_v11, %v128_v11 }
  0xea   :  { %v388_v14 = vpop.f32.mrf.mxu0 }
  0xeb   :  { %394 = vmatmul.mubr.msk.bf16.vlgmr.msra.gmra.mxu1 %vm84_vm1, %v129_v13 }
  0xec   :  { %409 = vmatprep.mubr.msk.bf16.mxu1 %vm499_vm0, %v498_v0  ;;  %406 = vmatpush3.bf16.msra.mxu1 %v426_v16 }
  0xed   :  { %407 = vmatprep.subr.bf16.mxu1 %v498_v0 }
  0xf0   :  { %408 = vmatpush3.bf16.msra.mxu1 %v427_v25 }
 0x1ab   :  { %v190_v18 = vpop.f32.mrf.mxu1 }
 0x1ac   :  { %v191_v19 = vadd.f32 %v357_v17, %v190_v18 }
 0x1ad   :  { %v395_v20 = vpop.f32.mrf.mxu1 }
 0x1ae   :  { %v196_v21 = vmax.f32 %v191_v19, 0.0 }
 0x1af   :  { %v193_v22 = vpop.f32.mrf.mxu1 }
 0x1b0   :  { %v197_v23 = vpack.c.bf16 %v196_v21, %v196_v21 }
 0x1b1   :  { %v396_v24 = vpop.f32.mrf.mxu1 }
 0x1b2   :  { %402 = vmatmul.mubr.msk.bf16.vlgmr.msra.gmra.mxu0 %vm84_vm1, %v197_v23 }
 0x272   :  { %v258_v27 = vpop.f32.mrf.mxu0 }
 0x273   :  { %v259_v28 = vadd.f32 %v361_v26, %v258_v27 }
 0x274   :  { %v403_v29 = vpop.f32.mrf.mxu0 }
 0x275   :  { %v264_v30 = vmax.f32 %v259_v28, 0.0 }
 0x276   :  { %v261_v31 = vpop.f32.mrf.mxu0 }
 0x277   :  { %v265_v32 = vpack.c.bf16 %v264_v30, %v264_v30 }
 0x278   :  { %v404_v33 = vpop.f32.mrf.mxu0 }
 0x279   :  { %410 = vmatmul.mubr.msk.bf16.vlgmr.msra.gmra.mxu1 %vm84_vm1, %v265_v32 }
 0x339   :  { %v326_v35 = vpop.f32.mrf.mxu1 }
 0x33a   :  { %v327_v36 = vadd.f32 %v365_v34, %v326_v35 }
 0x33b   :  { %v411_v37 = vpop.f32.mrf.mxu1 }
 0x33c   :  { %v332_v38 = vmax.f32 %v327_v36, 0.0 }
 0x33d   :  { %v329_v39 = vpop.f32.mrf.mxu1 }
 0x33e   :  { %v333_v40 = vmin.f32 %v332_v38, 1.0 }
 0x33f   :  { %v412_v41 = vpop.f32.mrf.mxu1 }
 0x340   :  { %v334_v42 = vpack.c.bf16 %v333_v40, %v333_v40 }
 0x342   :  { %336 = vst.msk [vmem:[#allocation7] sm:$0xf] %vm335_vm2, %v334_v42 }
 0x343   :  { %479 = shalt.err (!%p476_p0)
}
 0x344   :  { %346 = dma.vmem_to_hbm [thread:$0]  %s344_s6, 64, %s607_s9, [#allocation4]  }
 0x345   :  { %492 = dma.done.wait [#allocation4], 64  }
 0x346   :  { %493 = vsyncadd [#allocation4], 4294967232 }
 0x347   :  { %350 = vsyncpa [#allocation3], 1 }
 0x348   :  { %351 = vsyncpa [#allocation6], 1 }
 0x349   :  { %352 = vsyncpa [#allocation4], 1 }

</bundles_post_ra>
